<compile_context>
chip_gen: v7x
topology: tpu7x:2x2x1
jax: 0.10.0
libtpu: 0.0.40
codegen_flags: <defaults>
</compile_context>

<pallas_src>
import functools

import jax
import jax.numpy as jnp
from jax.experimental import pallas as pl
from jax.experimental.pallas import tpu as pltpu

WINDOW_SIZE = 4  # self.window_size in the PyTorch module
BN_EPS = 1e-5
PEEK = 8         # sublane-aligned peek into the next time chunk (>= WINDOW_SIZE - 1)


def _round_up(x, m):
    return (x + m - 1) // m * m


def _cnn_kernel(xm_ref, xnx_ref, w_ref, shift_ref, o_ref, *, bm, tl, l_out, k, pool):
    """One (batch-block, hidden-block, time-chunk) grid step.

    xm_ref:    (BM, TL, E)    this time chunk of raw x (compute dtype)
    xnx_ref:   (BM, PEEK, E)  first rows of the NEXT chunk (window overlap)
    w_ref:     (K, E, TH)     BN-scale-folded conv weight (grid-invariant in time)
    shift_ref: (1, TH)        folded conv-bias + BN shift
    o_ref:     (BM, TH)       pooled output block, resident across the time axis
    """
    s = pl.program_id(2)
    e = xm_ref.shape[2]
    th = o_ref.shape[1]

    @pl.when(s == 0)
    def _():
        if pool == "avg":
            o_ref[...] = jnp.zeros_like(o_ref)
        else:
            o_ref[...] = jnp.full_like(o_ref, -jnp.inf)

    # Sliding window for this chunk: TL + PEEK raw rows (in-kernel im2col).
    window = jnp.concatenate([xm_ref[...], xnx_ref[...]], axis=1)   # (BM, TL+PEEK, E)

    # Conv1d as K shifted MXU matmuls, accumulated in f32.
    acc = jnp.dot(window[:, 0:tl, :].reshape(bm * tl, e), w_ref[0],
                  preferred_element_type=jnp.float32)
    for kk in range(1, k):
        acc = acc + jnp.dot(window[:, kk:kk + tl, :].reshape(bm * tl, e), w_ref[kk],
                            preferred_element_type=jnp.float32)

    # Bias/BN shift + tanh epilogue (f32 -> v5e-safe), then per-batch-element view.
    y = jnp.tanh(acc + shift_ref[...]).reshape(bm, tl, th)

    # Conv rows at/after l_out (only present in the final chunk) are padding.
    t_idx = s * tl + jax.lax.broadcasted_iota(jnp.int32, (1, tl, 1), 1)
    valid = t_idx < l_out

    if pool == "avg":
        o_ref[...] += jnp.sum(jnp.where(valid, y, 0.0), axis=1)      # dense (BM,TH) store

        @pl.when(s == pl.num_programs(2) - 1)
        def _():
            o_ref[...] = o_ref[...] * jnp.float32(1.0 / l_out)
    else:
        part = jnp.max(jnp.where(valid, y, -jnp.inf), axis=1)        # (BM, TH)
        o_ref[...] = jnp.maximum(o_ref[...], part)


def init_cnn_params(key, embedding_dim, hidden_dim):
    """Deterministic parameter init mirroring the PyTorch module's shapes."""
    k_w, k_b, k_g, k_beta, k_mean, k_var = jax.random.split(key, 6)
    fan_in = embedding_dim * WINDOW_SIZE
    bound = 1.0 / jnp.sqrt(fan_in)
    weight = jax.random.uniform(
        k_w, (hidden_dim, embedding_dim, WINDOW_SIZE), jnp.float32, -bound, bound
    )
    bias = jax.random.uniform(k_b, (hidden_dim,), jnp.float32, -bound, bound)
    gamma = 1.0 + 0.1 * jax.random.normal(k_g, (hidden_dim,), jnp.float32)
    beta = 0.1 * jax.random.normal(k_beta, (hidden_dim,), jnp.float32)
    running_mean = 0.1 * jax.random.normal(k_mean, (hidden_dim,), jnp.float32)
    running_var = jnp.abs(1.0 + 0.1 * jax.random.normal(k_var, (hidden_dim,), jnp.float32))
    return {
        "weight": weight,
        "bias": bias,
        "gamma": gamma,
        "beta": beta,
        "running_mean": running_mean,
        "running_var": running_var,
    }


def cnn_forward(seq_tensor, seq_lengths, params, pool="max",
                compute_dtype=jnp.bfloat16, time_tile=None):
    """Pallas equivalent of CNN.forward.

    seq_tensor:  (B, L, E) float32 (channels-last; PyTorch transposes to NCL internally)
    seq_lengths: (B,) int32        (API parity only — see header TODO)
    returns:     (B, hidden_dim) float32
    """
    del seq_lengths  # pad branch decided from static L; keeps the wrapper jit-able
    x = jnp.asarray(seq_tensor, jnp.float32)
    B, L, E = x.shape
    H = params["weight"].shape[0]
    K = WINDOW_SIZE

    # PyTorch branch: if the sequence is shorter than the window, right-pad time by K-1.
    if L < K:
        x = jnp.pad(x, ((0, 0), (0, K - 1), (0, 0)))
        L = x.shape[1]
    l_out = L - K + 1

    # ---- fold eval-mode BatchNorm into the conv weight + one per-channel shift ----
    s = params["gamma"] / jnp.sqrt(params["running_var"] + BN_EPS)                # (H,)
    shift = (params["bias"] - params["running_mean"]) * s + params["beta"]        # (H,)
    # torch (C_out=H, C_in=E, K) -> (K, E, H), BN scale folded in.
    w = jnp.transpose(params["weight"], (2, 1, 0)).astype(jnp.float32) * s[None, None, :]

    # ---- tiling ----
    Hp = _round_up(H, 128)                    # lane-dense output stores
    BM = min(16, _round_up(B, 8))             # batch rows per block (multiple of 8)
    Bp = _round_up(B, BM)
    n_i = Bp // BM
    # Time chunk: bound BM*TL rows so the (BM*TL, TH) f32 epilogue stays small.
    if time_tile is None:
        TL = max(8, (2048 // BM) // 8 * 8)
    else:
        TL = max(8, _round_up(time_tile, 8))
    TL = min(TL, _round_up(l_out, 8))
    n_t = -(-l_out // TL)
    Lp = n_t * TL
    # Hidden split into two 128-aligned column blocks only when the batch gives a
    # single grid row (keeps both v7x TensorCores busy for small-batch inference).
    if n_i == 1 and Hp % 256 == 0:
        TH = Hp // 2
    else:
        TH = Hp
    n_h = Hp // TH

    # ---- pad / cast operands ----
    xp = jnp.pad(x, ((0, Bp - B), (0, Lp + PEEK - L), (0, 0))).astype(compute_dtype)
    w_p = jnp.pad(w, ((0, 0), (0, 0), (0, Hp - H))).astype(compute_dtype)
    shift_p = jnp.pad(shift.reshape(1, H), ((0, 0), (0, Hp - H))).astype(jnp.float32)

    kernel = functools.partial(_cnn_kernel, bm=BM, tl=TL, l_out=l_out, k=K, pool=pool)

    itemsize = jnp.dtype(compute_dtype).itemsize
    vmem_bytes = (2 * BM * TL * E * itemsize        # x chunk (double-buffered)
                  + 2 * BM * PEEK * E * itemsize    # next-chunk peek
                  + 2 * K * E * TH * itemsize       # folded weight
                  + 2 * TH * 4                      # shift
                  + 2 * BM * TH * 4                 # output block
                  + 4 * BM * TL * TH * 4)           # matmul/tanh intermediates headroom
    vmem_limit = int(min(max(vmem_bytes, 16 * 2 ** 20), 48 * 2 ** 20))

    cost = pl.CostEstimate(
        flops=int(2 * Bp * Lp * K * E * Hp),
        transcendentals=int(Bp * Lp * Hp),
        bytes_accessed=int(xp.size * itemsize * n_h + w_p.size * itemsize * n_i
                           + Bp * Hp * 4),
    )

    out = pl.pallas_call(
        kernel,
        out_shape=jax.ShapeDtypeStruct((Bp, Hp), jnp.float32),
        grid_spec=pltpu.PrefetchScalarGridSpec(
            num_scalar_prefetch=0,
            grid=(n_i, n_h, n_t),
            in_specs=[
                # This time chunk of raw x.
                pl.BlockSpec((BM, TL, E), lambda i, h, t: (i, t, 0)),
                # First PEEK rows of the NEXT chunk (covers the K-1 window overlap).
                pl.BlockSpec((BM, PEEK, E),
                             lambda i, h, t: (i, (t + 1) * (TL // PEEK), 0)),
                # Grid-invariant folded weight / shift (blocked along hidden).
                pl.BlockSpec((K, E, TH), lambda i, h, t: (0, 0, h)),
                pl.BlockSpec((1, TH), lambda i, h, t: (0, h)),
            ],
            out_specs=pl.BlockSpec((BM, TH), lambda i, h, t: (i, h)),
        ),
        compiler_params=pltpu.CompilerParams(
            dimension_semantics=("parallel", "parallel", "arbitrary"),
            vmem_limit_bytes=vmem_limit,
        ),
        cost_estimate=cost,
    )(xp, xp, w_p, shift_p)

    # Strip batch / hidden padding (out.view(out.size(0), -1) equivalent).
    return out[:B, :H]


def _reference_forward(seq_tensor, seq_lengths, params, pool="max"):
    """Plain-JAX reference for a sanity check (same math, no Pallas)."""
    del seq_lengths
    x = jnp.asarray(seq_tensor, jnp.float32)
    if x.shape[1] < WINDOW_SIZE:
        x = jnp.pad(x, ((0, 0), (0, WINDOW_SIZE - 1), (0, 0)))
    B, L, E = x.shape
    H = params["weight"].shape[0]
    l_out = L - WINDOW_SIZE + 1
    w = jnp.transpose(params["weight"], (2, 1, 0))
    conv = jnp.zeros((B, l_out, H), jnp.float32)
    for k in range(WINDOW_SIZE):
        conv = conv + jnp.einsum(
            "ble,eh->blh", x[:, k:k + l_out, :], w[k],
            precision=jax.lax.Precision.HIGHEST,
        )
    conv = conv + params["bias"][None, None, :]
    s = params["gamma"] / jnp.sqrt(params["running_var"] + BN_EPS)
    t = params["beta"] - params["running_mean"] * s
    y = jnp.tanh(conv * s[None, None, :] + t[None, None, :])
    if pool == "avg":
        return jnp.mean(y, axis=1)
    return jnp.max(y, axis=1)


if __name__ == "__main__":
    key = jax.random.PRNGKey(0)
    k1, k2, k3, k4 = jax.random.split(key, 4)

    # Config 1: small single-time-chunk case.
    batch, seq_len, embedding_dim, hidden_dim = 2, 16, 8, 32
    params1 = init_cnn_params(k1, embedding_dim, hidden_dim)
    x1 = jax.random.normal(k2, (batch, seq_len, embedding_dim), jnp.float32)
    len1 = jnp.array([seq_len, seq_len - 3], dtype=jnp.int32)

    # Config 2: multi-chunk time axis + hidden split into two 128-wide column blocks.
    params2 = init_cnn_params(k3, 16, 160)
    x2 = jax.random.normal(k4, (3, 37, 16), jnp.float32)
    len2 = jnp.array([37, 37, 20], dtype=jnp.int32)

    for pool in ("max", "avg"):
        ref1 = _reference_forward(x1, len1, params1, pool=pool)

        # Exact-ish f32 matmul-input path (v5e-friendly).
        out = jax.block_until_ready(
            cnn_forward(x1, len1, params1, pool=pool, compute_dtype=jnp.float32))
        assert out.shape == (batch, hidden_dim)
        assert jnp.allclose(out, ref1, atol=1e-3, rtol=1e-3), f"f32 mismatch ({pool})"

        # Default bf16 matmul-input path (v6e/v7x fast path).
        out = jax.block_until_ready(cnn_forward(x1, len1, params1, pool=pool))
        assert out.shape == (batch, hidden_dim)
        assert jnp.allclose(out, ref1, atol=3e-2, rtol=3e-2), f"bf16 mismatch ({pool})"

        # Multi time-chunk / split-hidden config (exercises accumulator + mask tail).
        out2 = jax.block_until_ready(
            cnn_forward(x2, len2, params2, pool=pool, time_tile=8))
        ref2 = _reference_forward(x2, len2, params2, pool=pool)
        assert out2.shape == (3, 160)
        assert jnp.allclose(out2, ref2, atol=3e-2, rtol=3e-2), f"bf16 mismatch cfg2 ({pool})"

    print("KERNEL_OK")
</pallas_src>

<mosaic_0001>
module attributes {stable_mosaic.version = 11 : i64} {
  func.func @_cnn_kernel(%arg0: i32, %arg1: i32, %arg2: i32, %arg3: memref<8x16x8xf32, #tpu.memory_space<vmem>>, %arg4: memref<8x8x8xf32, #tpu.memory_space<vmem>>, %arg5: memref<4x8x128xf32, #tpu.memory_space<vmem>>, %arg6: memref<1x128xf32, #tpu.memory_space<vmem>>, %arg7: memref<8x128xf32, #tpu.memory_space<vmem>>) attributes {dimension_semantics = [#tpu.dimension_semantics<parallel>, #tpu.dimension_semantics<parallel>, #tpu.dimension_semantics<arbitrary>], iteration_bounds = array<i64: 1, 1, 1>, scalar_prefetch = 0 : i64, scratch_operands = 0 : i64, tpu.core_type = #tpu.core_type<tc>, window_params = [{transform_indices = @transform_0, window_bounds = array<i64: 8, 16, 8>}, {transform_indices = @transform_1, window_bounds = array<i64: 8, 8, 8>}, {transform_indices = @transform_2, window_bounds = array<i64: 4, 8, 128>}, {transform_indices = @transform_3, window_bounds = array<i64: 1, 128>}, {transform_indices = @transform_4, window_bounds = array<i64: 8, 128>}]} {
    %c0_i32 = arith.constant 0 : i32
    %0 = arith.cmpi eq, %arg2, %c0_i32 : i32
    %1 = arith.extui %0 : i1 to i32
    %c0_i32_0 = arith.constant 0 : i32
    %2 = arith.cmpi ne, %1, %c0_i32_0 : i32
    scf.if %2 {
      %cst_26 = arith.constant 0xFF800000 : f32
      %48 = vector.broadcast %cst_26 : f32 to vector<8x128xf32>
      %c0_27 = arith.constant 0 : index
      %c0_28 = arith.constant 0 : index
      %49 = vector.load %arg7[%c0_27, %c0_28] : memref<8x128xf32, #tpu.memory_space<vmem>>, vector<8x128xf32>
      tpu.vector_store %arg7[%c0_27, %c0_28], %48 {strides = array<i32>} : memref<8x128xf32, #tpu.memory_space<vmem>>, vector<8x128xf32>,
    } else {
    }
    %c0 = arith.constant 0 : index
    %c0_1 = arith.constant 0 : index
    %c0_2 = arith.constant 0 : index
    %3 = vector.load %arg3[%c0, %c0_1, %c0_2] : memref<8x16x8xf32, #tpu.memory_space<vmem>>, vector<8x16x8xf32>
    %c0_3 = arith.constant 0 : index
    %c0_4 = arith.constant 0 : index
    %c0_5 = arith.constant 0 : index
    %4 = vector.load %arg4[%c0_3, %c0_4, %c0_5] : memref<8x8x8xf32, #tpu.memory_space<vmem>>, vector<8x8x8xf32>
    %5 = tpu.concatenate %3, %4 in 1 : vector<8x16x8xf32>, vector<8x8x8xf32> -> vector<8x24x8xf32>
    %6 = vector.extract_strided_slice %5 {offsets = [0, 0, 0], sizes = [8, 16, 8], strides = [1, 1, 1]} : vector<8x24x8xf32> to vector<8x16x8xf32>
    %7 = vector.shape_cast %6 : vector<8x16x8xf32> to vector<128x8xf32>
    %c0_6 = arith.constant 0 : index
    %c0_7 = arith.constant 0 : index
    %c0_8 = arith.constant 0 : index
    %8 = vector.load %arg5[%c0_6, %c0_7, %c0_8] : memref<4x8x128xf32, #tpu.memory_space<vmem>>, vector<1x8x128xf32>
    %9 = vector.shape_cast %8 : vector<1x8x128xf32> to vector<8x128xf32>
    %cst = arith.constant dense<0.000000e+00> : vector<128x128xf32>
    %10 = tpu.matmul %7, %9, %cst {dimension_numbers = #tpu.dot_dimension_numbers<[1], [0], [0], [1], [0, 0, 1, 1], [], []>} : vector<128x8xf32>, vector<8x128xf32>, vector<128x128xf32> -> vector<128x128xf32>
    %11 = vector.extract_strided_slice %5 {offsets = [0, 1, 0], sizes = [8, 16, 8], strides = [1, 1, 1]} : vector<8x24x8xf32> to vector<8x16x8xf32>
    %12 = vector.shape_cast %11 : vector<8x16x8xf32> to vector<128x8xf32>
    %c1 = arith.constant 1 : index
    %c0_9 = arith.constant 0 : index
    %c0_10 = arith.constant 0 : index
    %13 = vector.load %arg5[%c1, %c0_9, %c0_10] : memref<4x8x128xf32, #tpu.memory_space<vmem>>, vector<1x8x128xf32>
    %14 = vector.shape_cast %13 : vector<1x8x128xf32> to vector<8x128xf32>
    %cst_11 = arith.constant dense<0.000000e+00> : vector<128x128xf32>
    %15 = tpu.matmul %12, %14, %cst_11 {dimension_numbers = #tpu.dot_dimension_numbers<[1], [0], [0], [1], [0, 0, 1, 1], [], []>} : vector<128x8xf32>, vector<8x128xf32>, vector<128x128xf32> -> vector<128x128xf32>
    %16 = arith.addf %10, %15 : vector<128x128xf32>
    %17 = vector.extract_strided_slice %5 {offsets = [0, 2, 0], sizes = [8, 16, 8], strides = [1, 1, 1]} : vector<8x24x8xf32> to vector<8x16x8xf32>
    %18 = vector.shape_cast %17 : vector<8x16x8xf32> to vector<128x8xf32>
    %c2 = arith.constant 2 : index
    %c0_12 = arith.constant 0 : index
    %c0_13 = arith.constant 0 : index
    %19 = vector.load %arg5[%c2, %c0_12, %c0_13] : memref<4x8x128xf32, #tpu.memory_space<vmem>>, vector<1x8x128xf32>
    %20 = vector.shape_cast %19 : vector<1x8x128xf32> to vector<8x128xf32>
    %cst_14 = arith.constant dense<0.000000e+00> : vector<128x128xf32>
    %21 = tpu.matmul %18, %20, %cst_14 {dimension_numbers = #tpu.dot_dimension_numbers<[1], [0], [0], [1], [0, 0, 1, 1], [], []>} : vector<128x8xf32>, vector<8x128xf32>, vector<128x128xf32> -> vector<128x128xf32>
    %22 = arith.addf %16, %21 : vector<128x128xf32>
    %23 = vector.extract_strided_slice %5 {offsets = [0, 3, 0], sizes = [8, 16, 8], strides = [1, 1, 1]} : vector<8x24x8xf32> to vector<8x16x8xf32>
    %24 = vector.shape_cast %23 : vector<8x16x8xf32> to vector<128x8xf32>
    %c3 = arith.constant 3 : index
    %c0_15 = arith.constant 0 : index
    %c0_16 = arith.constant 0 : index
    %25 = vector.load %arg5[%c3, %c0_15, %c0_16] : memref<4x8x128xf32, #tpu.memory_space<vmem>>, vector<1x8x128xf32>
    %26 = vector.shape_cast %25 : vector<1x8x128xf32> to vector<8x128xf32>
    %cst_17 = arith.constant dense<0.000000e+00> : vector<128x128xf32>
    %27 = tpu.matmul %24, %26, %cst_17 {dimension_numbers = #tpu.dot_dimension_numbers<[1], [0], [0], [1], [0, 0, 1, 1], [], []>} : vector<128x8xf32>, vector<8x128xf32>, vector<128x128xf32> -> vector<128x128xf32>
    %28 = arith.addf %22, %27 : vector<128x128xf32>
    %c0_18 = arith.constant 0 : index
    %c0_19 = arith.constant 0 : index
    %29 = vector.load %arg6[%c0_18, %c0_19] : memref<1x128xf32, #tpu.memory_space<vmem>>, vector<1x128xf32>
    %30 = vector.broadcast %29 : vector<1x128xf32> to vector<128x128xf32>
    %31 = arith.addf %28, %30 : vector<128x128xf32>
    %32 = math.tanh %31 : vector<128x128xf32>
    %33 = vector.shape_cast %32 : vector<128x128xf32> to vector<8x16x128xf32>
    %c16_i32 = arith.constant 16 : i32
    %34 = arith.muli %arg2, %c16_i32 : i32
    %35 = tpu.iota {dimensions = array<i32: 1>} : vector<1x16x1xi32>
    %36 = vector.broadcast %34 : i32 to vector<1x16x1xi32>
    %37 = arith.addi %36, %35 : vector<1x16x1xi32>
    %c13_i32 = arith.constant 13 : i32
    %38 = vector.broadcast %c13_i32 : i32 to vector<1x16x1xi32>
    %39 = arith.cmpi slt, %37, %38 : vector<1x16x1xi32>
    %cst_20 = arith.constant 0xFF800000 : f32
    %40 = vector.shape_cast %39 : vector<1x16x1xi1> to vector<1x16x1xi1>
    %41 = vector.broadcast %40 : vector<1x16x1xi1> to vector<8x16x128xi1>
    %42 = vector.broadcast %cst_20 : f32 to vector<8x16x128xf32>
    %43 = arith.select %41, %33, %42 : vector<8x16x128xi1>, vector<8x16x128xf32>
    %cst_21 = arith.constant dense<0xFF800000> : vector<8x128xf32>
    %44 = vector.multi_reduction <maximumf>, %43, %cst_21 [1] : vector<8x16x128xf32> to vector<8x128xf32>
    %c0_22 = arith.constant 0 : index
    %c0_23 = arith.constant 0 : index
    %45 = vector.load %arg7[%c0_22, %c0_23] : memref<8x128xf32, #tpu.memory_space<vmem>>, vector<8x128xf32>
    %46 = arith.maximumf %45, %44 : vector<8x128xf32>
    %c0_24 = arith.constant 0 : index
    %c0_25 = arith.constant 0 : index
    %47 = vector.load %arg7[%c0_24, %c0_25] : memref<8x128xf32, #tpu.memory_space<vmem>>, vector<8x128xf32>
    tpu.vector_store %arg7[%c0_24, %c0_25], %46 {strides = array<i32>} : memref<8x128xf32, #tpu.memory_space<vmem>>, vector<8x128xf32>,
    return
  }
  func.func @transform_0(%arg0: i32, %arg1: i32, %arg2: i32) -> (i32, i32, i32) {
    %c0_i32 = arith.constant 0 : i32
    %c0_i32_0 = arith.constant 0 : i32
    return %arg0, %arg2, %c0_i32 : i32, i32, i32
  }
  func.func @transform_1(%arg0: i32, %arg1: i32, %arg2: i32) -> (i32, i32, i32) {
    %c1_i32 = arith.constant 1 : i32
    %0 = arith.addi %arg2, %c1_i32 : i32
    %c2_i32 = arith.constant 2 : i32
    %1 = arith.muli %0, %c2_i32 : i32
    %c0_i32 = arith.constant 0 : i32
    %c0_i32_0 = arith.constant 0 : i32
    return %arg0, %1, %c0_i32 : i32, i32, i32
  }
  func.func @transform_2(%arg0: i32, %arg1: i32, %arg2: i32) -> (i32, i32, i32) {
    %c0_i32 = arith.constant 0 : i32
    %c0_i32_0 = arith.constant 0 : i32
    %c0_i32_1 = arith.constant 0 : i32
    return %c0_i32, %c0_i32_0, %arg1 : i32, i32, i32
  }
  func.func @transform_3(%arg0: i32, %arg1: i32, %arg2: i32) -> (i32, i32) {
    %c0_i32 = arith.constant 0 : i32
    %c0_i32_0 = arith.constant 0 : i32
    return %c0_i32, %arg1 : i32, i32
  }
  func.func @transform_4(%arg0: i32, %arg1: i32, %arg2: i32) -> (i32, i32) {
    %c0_i32 = arith.constant 0 : i32
    return %arg0, %arg1 : i32, i32
  }
}

</mosaic_0001>

<bundles_post_ra>
// kernel: tpu_custom_call.1
= control target key start
LH: loop header
LB: loop body
LE: loop exit
PB: predicated region body
PF: predicated region fallthrough
CT: control target
= control target key end

     0   :  { %vm234_vm0 = vcmask 1046528   ;;  %vm632_vm1 = vcmask 1045504   ;;  %vm277_vm2 = vcmask 64512   ;;  %s2041_s0 = inlined_call_operand.vmem [shape: f32[8,24,8], index: 0, kind: input, shape index: {}]   ;;  %s2042_s1 = inlined_call_operand.vmem [shape: f32[8,24,8], index: 1, kind: input, shape index: {}]   ;;  %s2043_s2 = inlined_call_operand.vmem [shape: f32[4,8,128], index: 2, kind: input, shape index: {}]   ;;  %s2044_s3 = inlined_call_operand.vmem [shape: f32[1,128], index: 3, kind: input, shape index: {}]   ;;  %s2045_s4 = inlined_call_operand.hbm [shape: f32[8,128], index: 4, kind: output, shape index: {}]  }
   0x1   :  { %v1285_v0 = vld [vmem:[%s2043_s2 + $0x8] sm:$0xff]  ;;  %v1318_v1 = vld [vmem:[%s2043_s2 + $0x10] sm:$0xff]  ;;  %v1666_v2 = vld [vmem:[%s2041_s0] sm:$0xff] }
   0x2   :  { %1421 = vmatprep.subr.mxu1 %v1285_v0  ;;  %1473 = vmatprep.subr.mxu0 %v1318_v1  ;;  %v1671_v3 = vld [vmem:[%s2041_s0 + $0x8] sm:$0xff]  ;;  %v235_v4 = vrot.slane %v1666_v2, 1  ;;  %v209_v5 = vld [vmem:[%s2043_s2] sm:$0xff]  ;;  %v633_v6 = vrot.slane %v1666_v2, 2  ;;  %v1335_v7 = vld [vmem:[%s2043_s2 + $0x18] sm:$0xff] }
   0x3   :  { %1422 = vmatpush3.msra.mxu1 %v1285_v0  ;;  %1474 = vmatpush3.msra.mxu0 %v1318_v1  ;;  %v236_v8 = vrot.slane %v1671_v3, 1  ;;  %v634_v9 = vrot.slane %v1671_v3, 2  ;;  %v1686_v10 = vld [vmem:[%s2042_s1 + $0x10] sm:$0xff]  ;;  %v1691_v11 = vld [vmem:[%s2041_s0 + $0x18] sm:$0xff]  ;;  %v1696_v12 = vld [vmem:[%s2041_s0 + $0x20] sm:$0xff] }
   0x4   :  { %1447 = vmatprep.subr.mxu1 %v209_v5  ;;  %1499 = vmatprep.subr.mxu0 %v1335_v7  ;;  %v238_v13 = vrot.slane %v1686_v10, 1  ;;  %v636_v14 = vrot.slane %v1686_v10, 2  ;;  %v240_v15 = vrot.slane %v1691_v11, 1  ;;  %v1704_v16 = vld [vmem:[%s2042_s1 + $0x28] sm:$0xff]  ;;  %v1709_v17 = vld [vmem:[%s2041_s0 + $0x30] sm:$0xff]  ;;  %v241_v20 = vrot.slane %v1696_v12, 1 }
   0x5   :  { %v237_v18 = vsel %vm234_vm0, %v235_v4, %v236_v8  ;;  %v635_v19 = vsel %vm632_vm1, %v633_v6, %v634_v9  ;;  %v638_v21 = vrot.slane %v1691_v11, 2  ;;  %v1718_v22 = vld [vmem:[%s2041_s0 + $0x38] sm:$0xff]  ;;  %v639_v25 = vrot.slane %v1696_v12, 2  ;;  %v1729_v27 = vld [vmem:[%s2042_s1 + $0x40] sm:$0xff]  ;;  %v1740_v32 = vld [vmem:[%s2041_s0 + $0x48] sm:$0xff] }
   0x6   :  { %1423 = vmatprep.mubr.msk.f32.mxu1 %vm277_vm2, %v237_v18  ;;  %1475 = vmatprep.mubr.msk.f32.mxu0 %vm277_vm2, %v635_v19  ;;  %v239_v23 = vsel %vm234_vm0, %v236_v8, %v238_v13  ;;  %v637_v24 = vsel %vm632_vm1, %v634_v9, %v636_v14  ;;  %v243_v26 = vrot.slane %v1704_v16, 1  ;;  %v242_v28 = vsel %vm234_vm0, %v240_v15, %v241_v20  ;;  %v1745_v33 = vld [vmem:[%s2041_s0 + $0x50] sm:$0xff]  ;;  %v1754_v38 = vld [vmem:[%s2042_s1 + $0x58] sm:$0xff]  ;;  %v1765_v43 = vld [vmem:[%s2041_s0 + $0x60] sm:$0xff] }
   0x7   :  { %1424 = vmatmul.mubr.msk.f32.vlgmr.msra.gmra.mrb[0].mxu1 %vm277_vm2, %v239_v23  ;;  %1476 = vmatmul.mubr.msk.f32.vlgmr.msra.gmra.mrb[0].mxu0 %vm277_vm2, %v637_v24  ;;  %v641_v29 = vrot.slane %v1704_v16, 2  ;;  %v245_v30 = vrot.slane %v1709_v17, 1  ;;  %v246_v31 = vrot.slane %v1718_v22, 1  ;;  %v640_v34 = vsel %vm632_vm1, %v638_v21, %v639_v25  ;;  %v1770_v44 = vld [vmem:[%s2041_s0 + $0x68] sm:$0xff] }
   0x8   :  { %1448 = vmatpush3.msra.mxu1 %v209_v5  ;;  %1500 = vmatpush3.msra.mxu0 %v1335_v7  ;;  %v244_v35 = vsel %vm234_vm0, %v241_v20, %v243_v26  ;;  %v643_v36 = vrot.slane %v1709_v17, 2  ;;  %v644_v37 = vrot.slane %v1718_v22, 2  ;;  %v248_v41 = vrot.slane %v1729_v27, 1 }
   0x9   :  { %1426 = vmatprep.mubr.msk.f32.mxu1 %vm277_vm2, %v242_v28  ;;  %1478 = vmatprep.mubr.msk.f32.mxu0 %vm277_vm2, %v640_v34  ;;  %v642_v39 = vsel %vm632_vm1, %v639_v25, %v641_v29  ;;  %v247_v40 = vsel %vm234_vm0, %v245_v30, %v246_v31  ;;  %v646_v42 = vrot.slane %v1729_v27, 2  ;;  %v250_v46 = vrot.slane %v1740_v32, 1 }
   0xa   :  { %v645_v45 = vsel %vm632_vm1, %v643_v36, %v644_v37  ;;  %v251_v47 = vrot.slane %v1745_v33, 1  ;;  %v648_v48 = vrot.slane %v1740_v32, 2  ;;  %v249_v49 = vsel %vm234_vm0, %v246_v31, %v248_v41 }
   0xb   :  { %1427 = vmatmul.mubr.msk.f32.gmra.mrb[2].mxu1 %vm277_vm2, %v244_v35  ;;  %1479 = vmatmul.mubr.msk.f32.gmra.mrb[2].mxu0 %vm277_vm2, %v642_v39  ;;  %v649_v50 = vrot.slane %v1745_v33, 2  ;;  %v253_v51 = vrot.slane %v1754_v38, 1 }
   0xc   :  { %9 = vsyncpa [#allocation5], 0  ;;  %1429 = vmatprep.mubr.msk.f32.mxu1 %vm277_vm2, %v247_v40  ;;  %1481 = vmatprep.mubr.msk.f32.mxu0 %vm277_vm2, %v645_v45  ;;  %v647_v52 = vsel %vm632_vm1, %v644_v37, %v646_v42  ;;  %v651_v53 = vrot.slane %v1754_v38, 2  ;;  %v255_v54 = vrot.slane %v1765_v43, 1  ;;  %v256_v55 = vrot.slane %v1770_v44, 1  ;;  %v1790_v56 = vld [vmem:[%s2042_s1 + $0x70] sm:$0xff] }
   0xd   :  { %v252_v57 = vsel %vm234_vm0, %v250_v46, %v251_v47  ;;  %v650_v58 = vsel %vm632_vm1, %v648_v48, %v649_v50  ;;  %v653_v59 = vrot.slane %v1765_v43, 2  ;;  %v654_v60 = vrot.slane %v1770_v44, 2  ;;  %v1799_v61 = vld [vmem:[%s2041_s0 + $0x78] sm:$0xff]  ;;  %v1804_v62 = vld [vmem:[%s2041_s0 + $0x80] sm:$0xff]  ;;  %v1819_v7 = vld [vmem:[%s2042_s1 + $0x88] sm:$0xff] }
   0xe   :  { %v254_v63 = vsel %vm234_vm0, %v251_v47, %v253_v51  ;;  %v258_v0 = vrot.slane %v1790_v56, 1  ;;  %v656_v1 = vrot.slane %v1790_v56, 2  ;;  %v652_v4 = vsel %vm632_vm1, %v649_v50, %v651_v53  ;;  %v1828_v15 = vld [vmem:[%s2041_s0 + $0x90] sm:$0xff]  ;;  %v1833_v18 = vld [vmem:[%s2041_s0 + $0x98] sm:$0xff]  ;;  %v1852_v31 = vld [vmem:[%s2042_s1 + $0xa0] sm:$0xff] }
   0xf   :  { %1430 = vmatmul.mubr.msk.f32.gmra.mrb[4].mxu1 %vm277_vm2, %v249_v49  ;;  %1482 = vmatmul.mubr.msk.f32.gmra.mrb[4].mxu0 %vm277_vm2, %v647_v52  ;;  %v257_v5 = vsel %vm234_vm0, %v255_v54, %v256_v55  ;;  %v655_v6 = vsel %vm632_vm1, %v653_v59, %v654_v60  ;;  %v260_v8 = vrot.slane %v1799_v61, 1  ;;  %v261_v9 = vrot.slane %v1804_v62, 1  ;;  %v1857_v34 = vld [vmem:[%s2041_s0 + $0xa8] sm:$0xff]  ;;  %v1862_v35 = vld [vmem:[%s2041_s0 + $0xb0] sm:$0xff]  ;;  %v1881_v49 = vld [vmem:[%s2042_s1 + $0xb8] sm:$0xff] }
  0x10   :  { %1432 = vmatprep.mubr.msk.f32.mxu1 %vm277_vm2, %v252_v57  ;;  %1484 = vmatprep.mubr.msk.f32.mxu0 %vm277_vm2, %v650_v58  ;;  %v658_v13 = vrot.slane %v1799_v61, 2  ;;  %v659_v14 = vrot.slane %v1804_v62, 2  ;;  %v259_v19 = vsel %vm234_vm0, %v256_v55, %v258_v0  ;;  %v657_v20 = vsel %vm632_vm1, %v654_v60, %v656_v1 }
  0x11   :  { %v263_v21 = vrot.slane %v1819_v7, 1  ;;  %v661_v23 = vrot.slane %v1819_v7, 2  ;;  %v265_v24 = vrot.slane %v1828_v15, 1  ;;  %v266_v25 = vrot.slane %v1833_v18, 1 }
  0x12   :  { %v663_v26 = vrot.slane %v1828_v15, 2  ;;  %v664_v28 = vrot.slane %v1833_v18, 2  ;;  %v262_v29 = vsel %vm234_vm0, %v260_v8, %v261_v9  ;;  %v660_v30 = vsel %vm632_vm1, %v658_v13, %v659_v14 }
  0x13   :  { %1433 = vmatmul.mubr.msk.f32.gmra.mrb[6].mxu1 %vm277_vm2, %v254_v63  ;;  %1485 = vmatmul.mubr.msk.f32.gmra.mrb[6].mxu0 %vm277_vm2, %v652_v4  ;;  %v264_v36 = vsel %vm234_vm0, %v261_v9, %v263_v21  ;;  %v662_v37 = vsel %vm632_vm1, %v659_v14, %v661_v23  ;;  %v267_v39 = vsel %vm234_vm0, %v265_v24, %v266_v25  ;;  %v268_v41 = vrot.slane %v1852_v31, 1 }
  0x14   :  { %1435 = vmatprep.mubr.msk.f32.mxu1 %vm277_vm2, %v257_v5  ;;  %1487 = vmatprep.mubr.msk.f32.mxu0 %vm277_vm2, %v655_v6  ;;  %v665_v40 = vsel %vm632_vm1, %v663_v26, %v664_v28  ;;  %v666_v42 = vrot.slane %v1852_v31, 2  ;;  %v270_v45 = vrot.slane %v1857_v34, 1  ;;  %v271_v46 = vrot.slane %v1862_v35, 1 }
  0x15   :  { %v668_v47 = vrot.slane %v1857_v34, 2  ;;  %v669_v48 = vrot.slane %v1862_v35, 2  ;;  %v269_v50 = vsel %vm234_vm0, %v266_v25, %v268_v41  ;;  %v273_v52 = vrot.slane %v1881_v49, 1 }
  0x16   :  { %v667_v51 = vsel %vm632_vm1, %v664_v28, %v666_v42  ;;  %v671_v53 = vrot.slane %v1881_v49, 2  ;;  %v272_v54 = vsel %vm234_vm0, %v270_v45, %v271_v46  ;;  %v869_v57 = vrot.slane %v1666_v2, 3 }
  0x17   :  { %1436 = vmatmul.mubr.msk.f32.gmra.mrb[8].mxu1 %vm277_vm2, %v259_v19  ;;  %1488 = vmatmul.mubr.msk.f32.gmra.mrb[8].mxu0 %vm277_vm2, %v657_v20  ;;  %v670_v55 = vsel %vm632_vm1, %v668_v47, %v669_v48  ;;  %v870_v58 = vrot.slane %v1671_v3, 3  ;;  %vm868_vm3 = vcmask 1044480   ;;  %v872_v59 = vrot.slane %v1686_v10, 3 }
  0x18   :  { %1438 = vmatprep.mubr.msk.f32.mxu1 %vm277_vm2, %v262_v29  ;;  %1490 = vmatprep.mubr.msk.f32.mxu0 %vm277_vm2, %v660_v30  ;;  %v274_v60 = vsel %vm234_vm0, %v271_v46, %v273_v52  ;;  %v672_v63 = vsel %vm632_vm1, %v669_v48, %v671_v53  ;;  %v874_v1 = vrot.slane %v1691_v11, 3  ;;  %v875_v4 = vrot.slane %v1696_v12, 3 }
  0x19   :  { %v871_v0 = vsel %vm868_vm3, %v869_v57, %v870_v58  ;;  %v873_v10 = vsel %vm868_vm3, %v870_v58, %v872_v59  ;;  %v877_v5 = vrot.slane %v1704_v16, 3  ;;  %v879_v8 = vrot.slane %v1709_v17, 3 }
  0x1a   :  { %v876_v6 = vsel %vm868_vm3, %v874_v1, %v875_v4  ;;  %v880_v9 = vrot.slane %v1718_v22, 3  ;;  %v882_v16 = vrot.slane %v1729_v27, 3  ;;  %v884_v14 = vrot.slane %v1740_v32, 3 }
  0x1b   :  { %1439 = vmatmul.mubr.msk.f32.gmra.mrb[10].mxu1 %vm277_vm2, %v264_v36  ;;  %1491 = vmatmul.mubr.msk.f32.gmra.mrb[10].mxu0 %vm277_vm2, %v662_v37  ;;  %v885_v19 = vrot.slane %v1745_v33, 3  ;;  %v889_v20 = vrot.slane %v1765_v43, 3  ;;  %v890_v21 = vrot.slane %v1770_v44, 3  ;;  %v894_v23 = vrot.slane %v1799_v61, 3 }
  0x1c   :  { %1441 = vmatprep.mubr.msk.f32.mxu1 %vm277_vm2, %v267_v39  ;;  %1493 = vmatprep.mubr.msk.f32.mxu0 %vm277_vm2, %v665_v40  ;;  %v881_v13 = vsel %vm868_vm3, %v879_v8, %v880_v9  ;;  %v895_v24 = vrot.slane %v1804_v62, 3  ;;  %v899_v25 = vrot.slane %v1828_v15, 3  ;;  %v900_v26 = vrot.slane %v1833_v18, 3 }
  0x1d   :  { %v886_v27 = vsel %vm868_vm3, %v884_v14, %v885_v19  ;;  %v904_v28 = vrot.slane %v1857_v34, 3  ;;  %v905_v29 = vrot.slane %v1862_v35, 3  ;;  %v1144_v37 = vlaneseq }
  0x1e   :  { %vm1237_vm5 = vcmask 1041409   ;;  %vm1239_vm6 = vcmask 1042434   ;;  %vm1241_vm7 = vcmask 1043459   ;;  %vm1243_vm8 = vcmask 1044484  }
  0x1f   :  { %1442 = vmatmul.mubr.msk.f32.gmra.mrb[12].mxu1 %vm277_vm2, %v269_v50  ;;  %1494 = vmatmul.mubr.msk.f32.gmra.mrb[12].mxu0 %vm277_vm2, %v667_v51  ;;  %v906_v30 = vsel %vm868_vm3, %v904_v28, %v905_v29  ;;  %v1145_v46 = vshrl.u32 %v1144_v37, 7  ;;  %vm1245_vm9 = vcmask 1045509   ;;  %vm1247_vm10 = vcmask 1046534  }
  0x20   :  { %1444 = vmatprep.mubr.msk.f32.mxu1 %vm277_vm2, %v272_v54  ;;  %1496 = vmatprep.mubr.msk.f32.mxu0 %vm277_vm2, %v670_v55  ;;  %vm1249_vm11 = vcmask 1047559  }
  0x21   :  { %v1998_v55 = vadd.s32 8, %v1145_v46 }
  0x23   :  { %1445 = vmatmul.mubr.msk.f32.gmra.mrb[14].mxu1 %vm277_vm2, %v274_v60  ;;  %1497 = vmatmul.mubr.msk.f32.gmra.mrb[14].mxu0 %vm277_vm2, %v672_v63  ;;  %vm1151_vm4 = vcmp.lt.s32.totalorder %v1998_v55, 13 }
  0x24   :  { %1449 = vmatprep.mubr.msk.f32.mxu1 %vm277_vm2, %v1666_v2  ;;  %1501 = vmatprep.mubr.msk.f32.mxu0 %vm277_vm2, %v871_v0  ;;  %v878_v2 = vsel %vm868_vm3, %v875_v4, %v877_v5 }
  0x27   :  { %1450 = vmatmul.mubr.msk.f32.vlgmr.msra.gmra.mrb[0].mxu1 %vm277_vm2, %v1671_v3  ;;  %1502 = vmatmul.mubr.msk.f32.vlgmr.msra.gmra.mrb[0].mxu0 %vm277_vm2, %v873_v10  ;;  %v883_v3 = vsel %vm868_vm3, %v880_v9, %v882_v16 }
  0x28   :  { %1452 = vmatprep.mubr.msk.f32.mxu1 %vm277_vm2, %v1691_v11  ;;  %1504 = vmatprep.mubr.msk.f32.mxu0 %vm277_vm2, %v876_v6  ;;  %v887_v11 = vrot.slane %v1754_v38, 3  ;;  %v891_v38 = vsel %vm868_vm3, %v889_v20, %v890_v21 }
  0x2b   :  { %1453 = vmatmul.mubr.msk.f32.gmra.mrb[2].mxu1 %vm277_vm2, %v1696_v12  ;;  %1505 = vmatmul.mubr.msk.f32.gmra.mrb[2].mxu0 %vm277_vm2, %v878_v2  ;;  %v888_v12 = vsel %vm868_vm3, %v885_v19, %v887_v11 }
  0x2c   :  { %1455 = vmatprep.mubr.msk.f32.mxu1 %vm277_vm2, %v1709_v17  ;;  %1507 = vmatprep.mubr.msk.f32.mxu0 %vm277_vm2, %v881_v13  ;;  %v892_v17 = vrot.slane %v1790_v56, 3  ;;  %v896_v56 = vsel %vm868_vm3, %v894_v23, %v895_v24 }
  0x2f   :  { %1456 = vmatmul.mubr.msk.f32.gmra.mrb[4].mxu1 %vm277_vm2, %v1718_v22  ;;  %1508 = vmatmul.mubr.msk.f32.gmra.mrb[4].mxu0 %vm277_vm2, %v883_v3  ;;  %v893_v22 = vsel %vm868_vm3, %v890_v21, %v892_v17 }
  0x30   :  { %1458 = vmatprep.mubr.msk.f32.mxu1 %vm277_vm2, %v1740_v32  ;;  %1510 = vmatprep.mubr.msk.f32.mxu0 %vm277_vm2, %v886_v27  ;;  %v897_v32 = vrot.slane %v1819_v7, 3  ;;  %v901_v7 = vsel %vm868_vm3, %v899_v25, %v900_v26 }
  0x33   :  { %1459 = vmatmul.mubr.msk.f32.gmra.mrb[6].mxu1 %vm277_vm2, %v1745_v33  ;;  %1511 = vmatmul.mubr.msk.f32.gmra.mrb[6].mxu0 %vm277_vm2, %v888_v12  ;;  %v898_v33 = vsel %vm868_vm3, %v895_v24, %v897_v32 }
  0x34   :  { %1461 = vmatprep.mubr.msk.f32.mxu1 %vm277_vm2, %v1765_v43  ;;  %1513 = vmatprep.mubr.msk.f32.mxu0 %vm277_vm2, %v891_v38  ;;  %v902_v43 = vrot.slane %v1852_v31, 3 }
  0x37   :  { %1462 = vmatmul.mubr.msk.f32.gmra.mrb[8].mxu1 %vm277_vm2, %v1770_v44  ;;  %1514 = vmatmul.mubr.msk.f32.gmra.mrb[8].mxu0 %vm277_vm2, %v893_v22  ;;  %v903_v44 = vsel %vm868_vm3, %v900_v26, %v902_v43 }
  0x38   :  { %1464 = vmatprep.mubr.msk.f32.mxu1 %vm277_vm2, %v1799_v61  ;;  %1516 = vmatprep.mubr.msk.f32.mxu0 %vm277_vm2, %v896_v56  ;;  %v907_v61 = vrot.slane %v1881_v49, 3 }
  0x3b   :  { %1465 = vmatmul.mubr.msk.f32.gmra.mrb[10].mxu1 %vm277_vm2, %v1804_v62  ;;  %1517 = vmatmul.mubr.msk.f32.gmra.mrb[10].mxu0 %vm277_vm2, %v898_v33  ;;  %v908_v62 = vsel %vm868_vm3, %v905_v29, %v907_v61 }
  0x3c   :  { %1467 = vmatprep.mubr.msk.f32.mxu1 %vm277_vm2, %v1828_v15  ;;  %1519 = vmatprep.mubr.msk.f32.mxu0 %vm277_vm2, %v901_v7 }
  0x3f   :  { %1468 = vmatmul.mubr.msk.f32.gmra.mrb[12].mxu1 %vm277_vm2, %v1833_v18  ;;  %1520 = vmatmul.mubr.msk.f32.gmra.mrb[12].mxu0 %vm277_vm2, %v903_v44  ;;  %v1992_v18 = vld [vmem:[%s2044_s3] ss:$0 sm:$0xff]  ;;  %s1631_s3 = smov [#allocation4]  }
  0x40   :  { %1470 = vmatprep.mubr.msk.f32.mxu1 %vm277_vm2, %v1857_v34  ;;  %1522 = vmatprep.mubr.msk.f32.mxu0 %vm277_vm2, %v906_v30  ;;  %s1260_s17 = sshll.u32 %s1631_s3, 4  ;;  %s1261_s17 = int_to_ptr.vmem [resolvable:$true] %s1260_s17 }
  0x41   :  { %s1607_s18 = scalar_lea.vmem %s1261_s17, 128  ;;  %p1612_p1 = scmp.lt.s32.totalorder %s1261_s17, %s1261_s17 }
  0x42   :  { %p1608_p0 = scmp.ne.s32.totalorder %s1261_s17, %s1607_s18  ;;  %p1613_p2 = scmp.lt.s32.totalorder %s1607_s18, %s1607_s18 }
  0x43   :  { %1471 = vmatmul.mubr.msk.f32.gmra.mrb[14].mxu1 %vm277_vm2, %v1862_v35  ;;  %1523 = vmatmul.mubr.msk.f32.gmra.mrb[14].mxu0 %vm277_vm2, %v908_v62 }
  0x44   :  { %p1614_p3 = por %p1613_p2, %p1612_p1 }
  0x46   :  { %p1615_p4 = pnand %p1614_p3, %p1608_p0 }
  0xfa   :  { %v1451_v15 = vpop.f32.mrb[0].mxu1  ;;  %v1503_v31 = vpop.f32.mrb[0].mxu0 }
  0xfb   :  { %v1525_v36 = vadd.f32 %v1503_v31, %v1451_v15  ;;  %v553_v39 = vpop.f32.mrb[1].mxu1  ;;  %v1009_v34 = vpop.f32.mrb[1].mxu0 }
  0xfc   :  { %v1526_v40 = vadd.f32 %v1009_v34, %v553_v39 }
  0xfd   :  { %v1112_v41 = vadd.f32 %v1525_v36, %v1992_v18 }
  0xfe   :  { %v1111_v42 = vadd.f32 %v1526_v40, %v1992_v18  ;;  %v1454_v45 = vpop.f32.mrb[2].mxu1  ;;  %v1506_v35 = vpop.f32.mrb[2].mxu0 }
  0xff   :  { %1575 = vtanh.f32 %v1112_v41  ;;  %v1527_v47 = vadd.f32 %v1506_v35, %v1454_v45  ;;  %v563_v48 = vpop.f32.mrb[3].mxu1  ;;  %v1019_v49 = vpop.f32.mrb[3].mxu0 }
 0x100   :  { %1577 = vtanh.f32 %v1111_v42  ;;  %v1528_v50 = vadd.f32 %v1019_v49, %v563_v48 }
 0x101   :  { %v1114_v51 = vadd.f32 %v1527_v47, %v1992_v18 }
 0x102   :  { %v1113_v52 = vadd.f32 %v1528_v50, %v1992_v18  ;;  %v1457_v53 = vpop.f32.mrb[4].mxu1  ;;  %v1509_v54 = vpop.f32.mrb[4].mxu0 }
 0x103   :  { %1579 = vtanh.f32 %v1114_v51  ;;  %v1529_v57 = vadd.f32 %v1509_v54, %v1457_v53  ;;  %v573_v58 = vpop.f32.mrb[5].mxu1  ;;  %v1029_v59 = vpop.f32.mrb[5].mxu0 }
 0x104   :  { %1581 = vtanh.f32 %v1113_v52  ;;  %v1530_v60 = vadd.f32 %v1029_v59, %v573_v58 }
 0x105   :  { %v1116_v63 = vadd.f32 %v1529_v57, %v1992_v18 }
 0x106   :  { %v1115_v0 = vadd.f32 %v1530_v60, %v1992_v18  ;;  %v1460_v1 = vpop.f32.mrb[6].mxu1  ;;  %v1512_v4 = vpop.f32.mrb[6].mxu0 }
 0x107   :  { %1583 = vtanh.f32 %v1116_v63  ;;  %v1531_v10 = vadd.f32 %v1512_v4, %v1460_v1  ;;  %v583_v5 = vpop.f32.mrb[7].mxu1  ;;  %v1039_v6 = vpop.f32.mrb[7].mxu0 }
 0x108   :  { %1585 = vtanh.f32 %v1115_v0  ;;  %v1532_v8 = vadd.f32 %v1039_v6, %v583_v5 }
 0x109   :  { %v1576_v9 = vpop.eup %1575  ;;  %v1118_v2 = vadd.f32 %v1531_v10, %v1992_v18 }
 0x10a   :  { %v1578_v16 = vpop.eup %1577  ;;  %v1157_v13 = vsel %vm1151_vm4, %v1576_v9, -inf  ;;  %v1117_v14 = vadd.f32 %v1532_v8, %v1992_v18  ;;  %v1463_v19 = vpop.f32.mrb[8].mxu1 }
 0x10b   :  { %v1515_v3 = vpop.f32.mrb[8].mxu0  ;;  %v1172_v11 = vmax.f32 %v1578_v16, %v1157_v13  ;;  %1587 = vtanh.f32 %v1118_v2  ;;  %v593_v20 = vpop.f32.mrb[9].mxu1 }
 0x10c   :  { %v1533_v27 = vadd.f32 %v1515_v3, %v1463_v19  ;;  %v1049_v21 = vpop.f32.mrb[9].mxu0  ;;  %1589 = vtanh.f32 %v1117_v14 }
 0x10d   :  { %v1534_v12 = vadd.f32 %v1049_v21, %v593_v20  ;;  %v1580_v17 = vpop.eup %1579  ;;  %v1173_v38 = vrot.slane %v1172_v11, 4 }
 0x10e   :  { %v1120_v23 = vadd.f32 %v1533_v27, %v1992_v18  ;;  %v1582_v24 = vpop.eup %1581  ;;  %v1159_v22 = vsel %vm1151_vm4, %v1580_v17, -inf  ;;  %v1466_v56 = vpop.f32.mrb[10].mxu1 }
 0x10f   :  { %v1119_v32 = vadd.f32 %v1534_v12, %v1992_v18  ;;  %v1518_v25 = vpop.f32.mrb[10].mxu0  ;;  %v1174_v26 = vmax.f32 %v1172_v11, %v1173_v38  ;;  %v1179_v33 = vmax.f32 %v1582_v24, %v1159_v22  ;;  %v603_v7 = vpop.f32.mrb[11].mxu1 }
 0x110   :  { %1591 = vtanh.f32 %v1120_v23  ;;  %v1535_v43 = vadd.f32 %v1518_v25, %v1466_v56  ;;  %v1059_v28 = vpop.f32.mrb[11].mxu0 }
 0x111   :  { %1593 = vtanh.f32 %v1119_v32  ;;  %v1536_v29 = vadd.f32 %v1059_v28, %v603_v7  ;;  %v1584_v44 = vpop.eup %1583  ;;  %v1175_v61 = vrot.slane %v1174_v26, 2  ;;  %v1180_v30 = vrot.slane %v1179_v33, 4 }
 0x112   :  { %v1122_v62 = vadd.f32 %v1535_v43, %v1992_v18  ;;  %v1586_v15 = vpop.eup %1585  ;;  %v1161_v31 = vsel %vm1151_vm4, %v1584_v44, -inf  ;;  %v1469_v37 = vpop.f32.mrb[12].mxu1 }
 0x113   :  { %v1121_v36 = vadd.f32 %v1536_v29, %v1992_v18  ;;  %v1521_v39 = vpop.f32.mrb[12].mxu0  ;;  %v1181_v34 = vmax.f32 %v1179_v33, %v1180_v30  ;;  %v1186_v40 = vmax.f32 %v1586_v15, %v1161_v31  ;;  %v613_v41 = vpop.f32.mrb[13].mxu1  ;;  %v1176_v45 = vmax.f32 %v1174_v26, %v1175_v61 }
 0x114   :  { %1595 = vtanh.f32 %v1122_v62  ;;  %v1069_v42 = vpop.f32.mrb[13].mxu0  ;;  %v1537_v35 = vadd.f32 %v1521_v39, %v1469_v37 }
 0x115   :  { %1597 = vtanh.f32 %v1121_v36  ;;  %v1538_v46 = vadd.f32 %v1069_v42, %v613_v41  ;;  %v1588_v47 = vpop.eup %1587  ;;  %v1182_v48 = vrot.slane %v1181_v34, 2  ;;  %v1187_v49 = vrot.slane %v1186_v40, 4 }
 0x116   :  { %v1590_v50 = vpop.eup %1589  ;;  %v1163_v51 = vsel %vm1151_vm4, %v1588_v47, -inf  ;;  %v1124_v52 = vadd.f32 %v1537_v35, %v1992_v18  ;;  %v1472_v54 = vpop.f32.mrb[14].mxu1  ;;  %v1177_v1 = vrot.slane %v1176_v45, 1 }
 0x117   :  { %v1123_v53 = vadd.f32 %v1538_v46, %v1992_v18  ;;  %v1524_v57 = vpop.f32.mrb[14].mxu0  ;;  %v1183_v58 = vmax.f32 %v1181_v34, %v1182_v48  ;;  %v1188_v59 = vmax.f32 %v1186_v40, %v1187_v49  ;;  %v1193_v60 = vmax.f32 %v1590_v50, %v1163_v51  ;;  %v623_v63 = vpop.f32.mrb[15].mxu1 }
 0x118   :  { %v1079_v0 = vpop.f32.mrb[15].mxu0  ;;  %1599 = vtanh.f32 %v1124_v52  ;;  %v1539_v4 = vadd.f32 %v1524_v57, %v1472_v54  ;;  %v1178_v20 = vmax.f32 %v1176_v45, %v1177_v1 }
 0x119   :  { %v1540_v10 = vadd.f32 %v1079_v0, %v623_v63  ;;  %v1184_v6 = vrot.slane %v1183_v58, 1  ;;  %v1189_v8 = vrot.slane %v1188_v59, 2  ;;  %v1194_v9 = vrot.slane %v1193_v60, 4 }
 0x11a   :  { %v1592_v5 = vpop.eup %1591  ;;  %1601 = vtanh.f32 %v1123_v53  ;;  %v1126_v13 = vadd.f32 %v1539_v4, %v1992_v18 }
 0x11b   :  { %v1594_v2 = vpop.eup %1593  ;;  %v1165_v16 = vsel %vm1151_vm4, %v1592_v5, -inf  ;;  %v1125_v14 = vadd.f32 %v1540_v10, %v1992_v18  ;;  %v1185_v19 = vmax.f32 %v1183_v58, %v1184_v6  ;;  %v1190_v3 = vmax.f32 %v1188_v59, %v1189_v8 }
 0x11c   :  { %v1195_v11 = vmax.f32 %v1193_v60, %v1194_v9  ;;  %v1200_v27 = vmax.f32 %v1594_v2, %v1165_v16  ;;  %1603 = vtanh.f32 %v1126_v13 }
 0x11d   :  { %v1191_v12 = vrot.slane %v1190_v3, 1  ;;  %1605 = vtanh.f32 %v1125_v14  ;;  %v1238_v22 = vsel %vm1237_vm5, %v1185_v19, %v1178_v20 }
 0x11e   :  { %v1596_v21 = vpop.eup %1595  ;;  %v1196_v17 = vrot.slane %v1195_v11, 2  ;;  %v1201_v38 = vrot.slane %v1200_v27, 4 }
 0x11f   :  { %v1598_v23 = vpop.eup %1597  ;;  %v1167_v24 = vsel %vm1151_vm4, %v1596_v21, -inf  ;;  %v1192_v32 = vmax.f32 %v1190_v3, %v1191_v12 }
 0x120   :  { %v1197_v18 = vmax.f32 %v1195_v11, %v1196_v17  ;;  %v1202_v56 = vmax.f32 %v1200_v27, %v1201_v38  ;;  %v1207_v25 = vmax.f32 %v1598_v23, %v1167_v24 }
 0x121   :  { %v1240_v7 = vsel %vm1239_vm6, %v1192_v32, %v1238_v22 }
 0x122   :  { %v1198_v26 = vrot.slane %v1197_v18, 1  ;;  %v1203_v33 = vrot.slane %v1202_v56, 2  ;;  %v1208_v43 = vrot.slane %v1207_v25, 4  ;;  %v1600_v28 = vpop.eup %1599 }
 0x123   :  { %v1169_v30 = vsel %vm1151_vm4, %v1600_v28, -inf }
 0x124   :  { %v1602_v29 = vpop.eup %1601  ;;  %v1204_v44 = vmax.f32 %v1202_v56, %v1203_v33  ;;  %v1209_v61 = vmax.f32 %v1207_v25, %v1208_v43  ;;  %v1199_v62 = vmax.f32 %v1197_v18, %v1198_v26 }
 0x125   :  { %v1214_v15 = vmax.f32 %v1602_v29, %v1169_v30 }
 0x126   :  { %v1210_v31 = vrot.slane %v1209_v61, 2  ;;  %v1205_v36 = vrot.slane %v1204_v44, 1  ;;  %v1242_v37 = vsel %vm1241_vm7, %v1199_v62, %v1240_v7  ;;  %v1604_v39 = vpop.eup %1603 }
 0x127   :  { %v1215_v34 = vrot.slane %v1214_v15, 4  ;;  %v1606_v40 = vpop.eup %1605  ;;  %v1171_v41 = vsel %vm1151_vm4, %v1604_v39, -inf }
 0x128   :  { %v1206_v42 = vmax.f32 %v1204_v44, %v1205_v36  ;;  %v1211_v45 = vmax.f32 %v1209_v61, %v1210_v31  ;;  %v1221_v46 = vmax.f32 %v1606_v40, %v1171_v41 }
 0x129   :  { %v1216_v35 = vmax.f32 %v1214_v15, %v1215_v34 }
 0x12a   :  { %v1212_v47 = vrot.slane %v1211_v45, 1  ;;  %v1244_v48 = vsel %vm1243_vm8, %v1206_v42, %v1242_v37  ;;  %v1222_v49 = vrot.slane %v1221_v46, 4 }
 0x12b   :  { %v1217_v50 = vrot.slane %v1216_v35, 2 }
 0x12c   :  { %v1213_v51 = vmax.f32 %v1211_v45, %v1212_v47  ;;  %v1223_v53 = vmax.f32 %v1221_v46, %v1222_v49 }
 0x12d   :  { %v1218_v52 = vmax.f32 %v1216_v35, %v1217_v50 }
 0x12e   :  { %v1246_v54 = vsel %vm1245_vm9, %v1213_v51, %v1244_v48  ;;  %v1224_v58 = vrot.slane %v1223_v53, 2 }
 0x12f   :  { %v1219_v57 = vrot.slane %v1218_v52, 1 }
 0x130   :  { %v1225_v60 = vmax.f32 %v1223_v53, %v1224_v58 }
 0x131   :  { %v1220_v59 = vmax.f32 %v1218_v52, %v1219_v57 }
 0x132   :  { %v1226_v55 = vrot.slane %v1225_v60, 1 }
 0x133   :  { %v1248_v63 = vsel %vm1247_vm10, %v1220_v59, %v1246_v54 }
 0x134   :  { %v1227_v0 = vmax.f32 %v1225_v60, %v1226_v55 }
 0x136   :  { %v1250_v1 = vsel %vm1249_vm11, %v1227_v0, %v1248_v63 }
 0x137   :  { %1253 = vst [vmem:[#allocation4] sm:$0xff] %v1250_v1 }
 0x138   :  { %1618 = shalt.err (!%p1615_p4)
}
 0x139   :  { %s1619_s21 = scalar_lea.hbm %s2045_s4, 128 }
 0x13a   :  { %p1620_p5 = scmp.ne.s32.totalorder %s2045_s4, %s1619_s21  ;;  %p1623_p6 = scmp.lt.u32.totalorder %s1619_s21, %s2045_s4 }
 0x13c   :  { %p1625_p7 = pnand %p1623_p6, %p1620_p5 }
 0x13e   :  { %1628 = shalt.err (!%p1625_p7)
}
 0x13f   :  { %1263 = dma.vmem_to_hbm [thread:$0]  %s1261_s17, 128, %s2045_s4, [#allocation5]  }
 0x140   :  { %1629 = dma.done.wait [#allocation5], 128  }
 0x141   :  { %1630 = vsyncadd [#allocation5], 4294967168 }
 0x142   :  { %1267 = vsyncpa [#allocation5], 1 }

</bundles_post_ra>
